<compile_context>
chip_gen: v5e
topology: v5e:2x2
jax: 0.10.0
libtpu: 0.0.40
codegen_flags: <defaults>
</compile_context>

<pallas_src>
import functools
import math

import jax
import jax.numpy as jnp
from jax.experimental import pallas as pl
from jax.experimental.pallas import tpu as pltpu


def _bce_sum_kernel(logits_ref, targets_ref, pwm1_ref, out_ref, *,
                    n_valid, tile_n, width):
    """Accumulates BCE-with-logits partial sums into out_ref (1, 8, W)."""
    s = pl.program_id(0)                 # parallel (megacore) split index
    i = pl.program_id(1)                 # reduction-tile index within the split

    @pl.when(i == 0)
    def _():
        out_ref[...] = jnp.zeros_like(out_ref)

    x = logits_ref[...].astype(jnp.float32)
    t = targets_ref[...].astype(jnp.float32)
    pwm1 = pwm1_ref[...].astype(jnp.float32)      # (1, W) -> broadcasts to (TILE_N, W)

    # Numerically stable BCEWithLogits with pos_weight (matches torch):
    #   L = (1 - t) * x + (1 + (pw - 1) * t) * softplus(-x)
    softplus_neg_x = jnp.maximum(-x, 0.0) + jnp.log1p(jnp.exp(-jnp.abs(x)))
    bce = (1.0 - t) * x + (1.0 + pwm1 * t) * softplus_neg_x

    # Logical (unclamped) row offset of this tile; used both to detect whether
    # any element of the tile is past the valid data and to build the mask.
    row0 = (s * pl.num_programs(1) + i) * tile_n
    tile_full = (row0 + tile_n) * width <= n_valid

    def fold(block):
        # (TILE_N, W) -> (8, W) slab of partial sums: pure sublane-aligned VPU adds.
        return block.reshape(tile_n // 8, 8, width).sum(axis=0)[None, :, :]

    @pl.when(tile_full)
    def _():                              # fast path: no iota / compare / select
        out_ref[...] += fold(bce)

    @pl.when(jnp.logical_not(tile_full))
    def _():                              # boundary tile(s) only
        rows = row0 + jax.lax.broadcasted_iota(jnp.int32, (tile_n, 1), 0)
        cols = jax.lax.broadcasted_iota(jnp.int32, (1, width), 1)
        flat = rows * width + cols        # flat element index in the original N*C order
        out_ref[...] += fold(jnp.where(flat < n_valid, bce, 0.0))


def multilabel_custom_loss(logits, targets, pos_weights,
                           gamma=2.0, alpha=0.25, smooth=1e-6, focal=True,
                           tile_n=None, buffers=2,
                           input_vmem_budget_bytes=16 * 1024 * 1024):
    """Mirror of MultiLabelCustomLoss.forward. Returns (loss, bce_loss_out, 0).

    gamma / alpha / smooth only feed the focal branch, whose result the
    reference module overwrites with the plain BCE mean, so they never affect
    the returned values. `loss` and `bce_loss_out` are device scalars — call
    `.item()` outside the hot path if a Python float is needed.
    """
    # TODO(synk): reference raises NameError when focal=False (`loss` undefined);
    # here we always return the BCE mean.
    del gamma, alpha, smooth, focal  # no effect on any returned value

    n, c = logits.shape
    n_valid = n * c
    pwm1 = jnp.reshape(pos_weights.astype(jnp.float32) - 1.0, (1, c))

    # ---- lane-densify: fold r rows into the lane axis when C % 128 != 0 ------
    if c % 128 == 0:
        width = c
        lg, tg = logits, targets
        pwm1_row = pwm1
    else:
        r = 128 // math.gcd(c, 128)          # smallest r with (r*c) % 128 == 0
        width = r * c
        n_rows_pad = pl.cdiv(n, r) * r
        if n_rows_pad != n:
            # TODO(synk): this pad is one extra HBM pass; callers with N % r == 0 avoid it.
            lg = jnp.pad(logits, ((0, n_rows_pad - n), (0, 0)))
            tg = jnp.pad(targets, ((0, n_rows_pad - n), (0, 0)))
        else:
            lg, tg = logits, targets
        lg = lg.reshape(n_rows_pad // r, width)     # contiguous reshape: free
        tg = tg.reshape(n_rows_pad // r, width)
        pwm1_row = jnp.tile(pwm1, (1, r))

    n_rows = lg.shape[0]
    if n_rows < 16:                         # keep block row dim <= array row dim
        lg = jnp.pad(lg, ((0, 16 - n_rows), (0, 0)))
        tg = jnp.pad(tg, ((0, 16 - n_rows), (0, 0)))
        n_rows = 16

    # ---- tile sizing by bytes: `buffers` pipeline copies of both streaming
    # inputs must fit the budget (default 16 MiB -> ~4 MiB per input block). ---
    bytes_per_row = width * (jnp.dtype(lg.dtype).itemsize +
                             jnp.dtype(tg.dtype).itemsize)
    if tile_n is None:
        max_rows = max(16, input_vmem_budget_bytes // (buffers * bytes_per_row))
        tile_n = (max_rows // 16) * 16
    tile_n = max(16, (tile_n // 16) * 16)          # multiple of 16: f32 & bf16 safe
    tile_n = min(tile_n, (n_rows // 16) * 16)      # never exceed the (padded) rows

    total_tiles = pl.cdiv(n_rows, tile_n)
    # Always split across both TensorCores (v7x) when there is >= 2 tiles of work.
    num_splits = 2 if total_tiles >= 2 else 1
    tiles_per_split = pl.cdiv(total_tiles, num_splits)
    last_block = total_tiles - 1

    def in_block(s, i):
        # Clamp so the (possibly) out-of-range tile of the second split reads
        # in-bounds data; the in-kernel validity mask zeroes its contribution.
        return (jnp.minimum(s * tiles_per_split + i, last_block), 0)

    kernel = functools.partial(_bce_sum_kernel, n_valid=n_valid,
                               tile_n=tile_n, width=width)

    stream_kwargs = {}
    if buffers != 2:                               # sweepable pipeline depth (v7x)
        stream_kwargs = dict(pipeline_mode=pl.Buffered(buffers))

    input_block_bytes = buffers * tile_n * bytes_per_row
    vmem_limit = int(min(56 * 2**20, max(24 * 2**20, input_block_bytes + (8 << 20))))

    partial_sums = pl.pallas_call(
        kernel,
        out_shape=jax.ShapeDtypeStruct((num_splits, 8, width), jnp.float32),
        grid=(num_splits, tiles_per_split),
        in_specs=[
            pl.BlockSpec((tile_n, width), in_block, **stream_kwargs),  # logits
            pl.BlockSpec((tile_n, width), in_block, **stream_kwargs),  # targets
            pl.BlockSpec((1, width), lambda s, i: (0, 0)),             # pos_weights - 1
        ],
        out_specs=pl.BlockSpec((1, 8, width), lambda s, i: (s, 0, 0)),
        compiler_params=pltpu.CompilerParams(
            dimension_semantics=("parallel", "arbitrary"),
            vmem_limit_bytes=vmem_limit),
    )(lg, tg, pwm1_row)

    mean_bce = jnp.sum(partial_sums) / n_valid

    loss = mean_bce            # reference: `loss = bce_loss.mean()`
    bce_loss_out = mean_bce    # reference: `bce_loss.mean().item()` — kept on device
    return loss, bce_loss_out, 0


if __name__ == "__main__":
    key = jax.random.PRNGKey(0)
    k1, k2, k3 = jax.random.split(key, 3)

    def ref_mean(lg, tg, pw):
        sp = jnp.maximum(-lg, 0.0) + jnp.log1p(jnp.exp(-jnp.abs(lg)))
        bce = (1.0 - tg) * lg + (1.0 + (pw[None, :] - 1.0) * tg) * sp
        return float(jnp.mean(bce))

    # Small multi-label batch, lane-aligned C.
    N, C = 24, 128
    logits = jax.random.normal(k1, (N, C), dtype=jnp.float32) * 2.0
    targets = (jax.random.uniform(k2, (N, C)) > 0.7).astype(jnp.float32)
    pos_weights = 1.0 + jax.random.uniform(k3, (C,), dtype=jnp.float32) * 3.0
    ref = ref_mean(logits, targets, pos_weights)

    # 1) Default byte-targeted tiling.
    loss, bce_out, zero = multilabel_custom_loss(logits, targets, pos_weights)
    loss = jax.block_until_ready(loss)
    assert abs(float(loss) - ref) < 1e-4, (float(loss), ref)
    assert abs(float(bce_out) - ref) < 1e-4
    assert int(zero) == 0

    # 2) Forced 16-row tile: exercises the grid, the always-on megacore split
    #    (2 splits for 2 tiles), and the ragged-row mask (rows 24..31 padded).
    loss2, _, _ = multilabel_custom_loss(logits, targets, pos_weights, tile_n=16)
    assert abs(float(jax.block_until_ready(loss2)) - ref) < 1e-4

    # 3) Lane-densifying fold path: C=48 (not a multiple of 128), N=20 (needs pad).
    k4, k5, k6 = jax.random.split(jax.random.PRNGKey(1), 3)
    N2, C2 = 20, 48
    lg2 = jax.random.normal(k4, (N2, C2), dtype=jnp.float32)
    tg2 = (jax.random.uniform(k5, (N2, C2)) > 0.5).astype(jnp.float32)
    pw2 = 1.0 + jax.random.uniform(k6, (C2,), dtype=jnp.float32)
    ref2 = ref_mean(lg2, tg2, pw2)
    loss3, _, _ = multilabel_custom_loss(lg2, tg2, pw2)
    assert abs(float(jax.block_until_ready(loss3)) - ref2) < 1e-4

    # 4) Jittable end to end (no host sync inside the wrapper).
    loss4 = jax.block_until_ready(
        jax.jit(lambda a, b, w: multilabel_custom_loss(a, b, w)[0])(
            logits, targets, pos_weights))
    assert abs(float(loss4) - ref) < 1e-4

    print("KERNEL_OK")
</pallas_src>

<mosaic_0001>
module attributes {stable_mosaic.version = 11 : i64} {
  func.func @_bce_sum_kernel(%arg0: i32, %arg1: i32, %arg2: memref<16x128xf32, #tpu.memory_space<vmem>>, %arg3: memref<16x128xf32, #tpu.memory_space<vmem>>, %arg4: memref<1x128xf32, #tpu.memory_space<vmem>>, %arg5: memref<1x8x128xf32, #tpu.memory_space<vmem>>) attributes {dimension_semantics = [#tpu.dimension_semantics<parallel>, #tpu.dimension_semantics<arbitrary>], iteration_bounds = array<i64: 2, 1>, scalar_prefetch = 0 : i64, scratch_operands = 0 : i64, tpu.core_type = #tpu.core_type<tc>, window_params = [{transform_indices = @transform_0, window_bounds = array<i64: 16, 128>}, {transform_indices = @transform_1, window_bounds = array<i64: 16, 128>}, {pipeline_mode = #tpu.pipeline_mode<synchronous>, transform_indices = @transform_2, window_bounds = array<i64: 1, 128>}, {transform_indices = @transform_3, window_bounds = array<i64: 1, 8, 128>}]} {
    %c0_i32 = arith.constant 0 : i32
    %0 = arith.cmpi eq, %arg1, %c0_i32 : i32
    %1 = arith.extui %0 : i1 to i32
    %c0_i32_0 = arith.constant 0 : i32
    %2 = arith.cmpi ne, %1, %c0_i32_0 : i32
    scf.if %2 {
      %cst_13 = arith.constant 0.000000e+00 : f32
      %36 = vector.broadcast %cst_13 : f32 to vector<1x8x128xf32>
      %c0_14 = arith.constant 0 : index
      %c0_15 = arith.constant 0 : index
      %c0_16 = arith.constant 0 : index
      %37 = vector.load %arg5[%c0_14, %c0_15, %c0_16] : memref<1x8x128xf32, #tpu.memory_space<vmem>>, vector<1x8x128xf32>
      tpu.vector_store %arg5[%c0_14, %c0_15, %c0_16], %36 {strides = array<i32>} : memref<1x8x128xf32, #tpu.memory_space<vmem>>, vector<1x8x128xf32>,
    } else {
    }
    %c0 = arith.constant 0 : index
    %c0_1 = arith.constant 0 : index
    %3 = vector.load %arg2[%c0, %c0_1] : memref<16x128xf32, #tpu.memory_space<vmem>>, vector<16x128xf32>
    %c0_2 = arith.constant 0 : index
    %c0_3 = arith.constant 0 : index
    %4 = vector.load %arg3[%c0_2, %c0_3] : memref<16x128xf32, #tpu.memory_space<vmem>>, vector<16x128xf32>
    %c0_4 = arith.constant 0 : index
    %c0_5 = arith.constant 0 : index
    %5 = vector.load %arg4[%c0_4, %c0_5] : memref<1x128xf32, #tpu.memory_space<vmem>>, vector<1x128xf32>
    %cst = arith.constant 0.000000e+00 : f32
    %6 = vector.broadcast %cst : f32 to vector<16x128xf32>
    %7 = arith.subf %6, %3 : vector<16x128xf32>
    %cst_6 = arith.constant 0.000000e+00 : f32
    %8 = vector.broadcast %cst_6 : f32 to vector<16x128xf32>
    %9 = arith.maximumf %7, %8 : vector<16x128xf32>
    %10 = math.absf %3 : vector<16x128xf32>
    %cst_7 = arith.constant 0.000000e+00 : f32
    %11 = vector.broadcast %cst_7 : f32 to vector<16x128xf32>
    %12 = arith.subf %11, %10 : vector<16x128xf32>
    %13 = math.exp %12 : vector<16x128xf32>
    %14 = math.log1p %13 : vector<16x128xf32>
    %15 = arith.addf %9, %14 : vector<16x128xf32>
    %cst_8 = arith.constant 1.000000e+00 : f32
    %16 = vector.broadcast %cst_8 : f32 to vector<16x128xf32>
    %17 = arith.subf %16, %4 : vector<16x128xf32>
    %18 = arith.mulf %17, %3 : vector<16x128xf32>
    %19 = vector.broadcast %5 : vector<1x128xf32> to vector<16x128xf32>
    %20 = arith.mulf %19, %4 : vector<16x128xf32>
    %cst_9 = arith.constant 1.000000e+00 : f32
    %21 = vector.broadcast %cst_9 : f32 to vector<16x128xf32>
    %22 = arith.addf %21, %20 : vector<16x128xf32>
    %23 = arith.mulf %22, %15 : vector<16x128xf32>
    %24 = arith.addf %18, %23 : vector<16x128xf32>
    %c1_i32 = arith.constant 1 : i32
    %25 = arith.muli %arg0, %c1_i32 : i32
    %26 = arith.addi %25, %arg1 : i32
    %c16_i32 = arith.constant 16 : i32
    %27 = arith.muli %26, %c16_i32 : i32
    %c16_i32_10 = arith.constant 16 : i32
    %28 = arith.addi %27, %c16_i32_10 : i32
    %c128_i32 = arith.constant 128 : i32
    %29 = arith.muli %28, %c128_i32 : i32
    %c3072_i32 = arith.constant 3072 : i32
    %30 = arith.cmpi sle, %29, %c3072_i32 : i32
    %31 = arith.extui %30 : i1 to i32
    %c0_i32_11 = arith.constant 0 : i32
    %32 = arith.cmpi ne, %31, %c0_i32_11 : i32
    scf.if %32 {
      %c0_13 = arith.constant 0 : index
      %c0_14 = arith.constant 0 : index
      %c0_15 = arith.constant 0 : index
      %36 = vector.load %arg5[%c0_13, %c0_14, %c0_15] : memref<1x8x128xf32, #tpu.memory_space<vmem>>, vector<1x8x128xf32>
      %37 = vector.shape_cast %24 : vector<16x128xf32> to vector<2x8x128xf32>
      %cst_16 = arith.constant dense<0.000000e+00> : vector<8x128xf32>
      %38 = vector.multi_reduction <add>, %37, %cst_16 [0] : vector<2x8x128xf32> to vector<8x128xf32>
      %39 = vector.shape_cast %38 : vector<8x128xf32> to vector<1x8x128xf32>
      %40 = arith.addf %36, %39 : vector<1x8x128xf32>
      %c0_17 = arith.constant 0 : index
      %c0_18 = arith.constant 0 : index
      %c0_19 = arith.constant 0 : index
      %41 = vector.load %arg5[%c0_17, %c0_18, %c0_19] : memref<1x8x128xf32, #tpu.memory_space<vmem>>, vector<1x8x128xf32>
      tpu.vector_store %arg5[%c0_17, %c0_18, %c0_19], %40 {strides = array<i32>} : memref<1x8x128xf32, #tpu.memory_space<vmem>>, vector<1x8x128xf32>,
    } else {
    }
    %true = arith.constant true
    %33 = arith.xori %30, %true : i1
    %34 = arith.extui %33 : i1 to i32
    %c0_i32_12 = arith.constant 0 : i32
    %35 = arith.cmpi ne, %34, %c0_i32_12 : i32
    scf.if %35 {
      %36 = tpu.iota {dimensions = array<i32: 0>} : vector<16x1xi32>
      %37 = vector.broadcast %27 : i32 to vector<16x1xi32>
      %38 = arith.addi %37, %36 : vector<16x1xi32>
      %39 = tpu.iota {dimensions = array<i32: 1>} : vector<1x128xi32>
      %c128_i32_13 = arith.constant 128 : i32
      %40 = vector.broadcast %c128_i32_13 : i32 to vector<16x1xi32>
      %41 = arith.muli %38, %40 : vector<16x1xi32>
      %42 = vector.broadcast %41 : vector<16x1xi32> to vector<16x128xi32>
      %43 = vector.broadcast %39 : vector<1x128xi32> to vector<16x128xi32>
      %44 = arith.addi %42, %43 : vector<16x128xi32>
      %c0_14 = arith.constant 0 : index
      %c0_15 = arith.constant 0 : index
      %c0_16 = arith.constant 0 : index
      %45 = vector.load %arg5[%c0_14, %c0_15, %c0_16] : memref<1x8x128xf32, #tpu.memory_space<vmem>>, vector<1x8x128xf32>
      %c3072_i32_17 = arith.constant 3072 : i32
      %46 = vector.broadcast %c3072_i32_17 : i32 to vector<16x128xi32>
      %47 = arith.cmpi slt, %44, %46 : vector<16x128xi32>
      %cst_18 = arith.constant 0.000000e+00 : f32
      %48 = vector.broadcast %cst_18 : f32 to vector<16x128xf32>
      %49 = arith.select %47, %24, %48 : vector<16x128xi1>, vector<16x128xf32>
      %50 = vector.shape_cast %49 : vector<16x128xf32> to vector<2x8x128xf32>
      %cst_19 = arith.constant dense<0.000000e+00> : vector<8x128xf32>
      %51 = vector.multi_reduction <add>, %50, %cst_19 [0] : vector<2x8x128xf32> to vector<8x128xf32>
      %52 = vector.shape_cast %51 : vector<8x128xf32> to vector<1x8x128xf32>
      %53 = arith.addf %45, %52 : vector<1x8x128xf32>
      %c0_20 = arith.constant 0 : index
      %c0_21 = arith.constant 0 : index
      %c0_22 = arith.constant 0 : index
      %54 = vector.load %arg5[%c0_20, %c0_21, %c0_22] : memref<1x8x128xf32, #tpu.memory_space<vmem>>, vector<1x8x128xf32>
      tpu.vector_store %arg5[%c0_20, %c0_21, %c0_22], %53 {strides = array<i32>} : memref<1x8x128xf32, #tpu.memory_space<vmem>>, vector<1x8x128xf32>,
    } else {
    }
    return
  }
  func.func @transform_0(%arg0: i32, %arg1: i32) -> (i32, i32) {
    %c1_i32 = arith.constant 1 : i32
    %0 = arith.muli %arg0, %c1_i32 : i32
    %1 = arith.addi %0, %arg1 : i32
    %c1_i32_0 = arith.constant 1 : i32
    %2 = arith.minsi %1, %c1_i32_0 : i32
    %c0_i32 = arith.constant 0 : i32
    %c0_i32_1 = arith.constant 0 : i32
    return %2, %c0_i32 : i32, i32
  }
  func.func @transform_1(%arg0: i32, %arg1: i32) -> (i32, i32) {
    %c1_i32 = arith.constant 1 : i32
    %0 = arith.muli %arg0, %c1_i32 : i32
    %1 = arith.addi %0, %arg1 : i32
    %c1_i32_0 = arith.constant 1 : i32
    %2 = arith.minsi %1, %c1_i32_0 : i32
    %c0_i32 = arith.constant 0 : i32
    %c0_i32_1 = arith.constant 0 : i32
    return %2, %c0_i32 : i32, i32
  }
  func.func @transform_2(%arg0: i32, %arg1: i32) -> (i32, i32) {
    %c0_i32 = arith.constant 0 : i32
    %c0_i32_0 = arith.constant 0 : i32
    %c0_i32_1 = arith.constant 0 : i32
    return %c0_i32, %c0_i32_0 : i32, i32
  }
  func.func @transform_3(%arg0: i32, %arg1: i32) -> (i32, i32, i32) {
    %c0_i32 = arith.constant 0 : i32
    %c0_i32_0 = arith.constant 0 : i32
    %c0_i32_1 = arith.constant 0 : i32
    return %arg0, %c0_i32, %c0_i32_0 : i32, i32, i32
  }
}

</mosaic_0001>

<bundles_post_ra>
// kernel: tpu_custom_call.1
= control target key start
LH: loop header
LB: loop body
LE: loop exit
PB: predicated region body
PF: predicated region fallthrough
CT: control target
= control target key end

     0   :  { %s1115_s0 = inlined_call_operand.hbm [shape: f32[24,128], index: 0, kind: input, shape index: {}]   ;;  %s1116_s1 = inlined_call_operand.hbm [shape: f32[24,128], index: 1, kind: input, shape index: {}]   ;;  %s1117_s2 = inlined_call_operand.vmem [shape: f32[1,128], index: 2, kind: input, shape index: {}]   ;;  %s1118_s3 = inlined_call_operand.hbm [shape: f32[2,8,128], index: 3, kind: output, shape index: {}]  }
   0x1   :  { %1122 = sst [smem:[#allocation14_spill]] %s1115_s0 }
   0x2   :  { %8 = vsyncpa [#allocation3], 0 }
   0x3   :  { %10 = vsyncpa [#allocation3 + $0x1], 0 }
   0x4   :  { %11 = vsyncpa [#allocation6], 0 }
   0x5   :  { %13 = vsyncpa [#allocation6 + $0x1], 0 }
   0x6   :  { %14 = vsyncpa [#allocation4], 0 }
   0x7   :  { %16 = vsyncpa [#allocation4 + $0x1], 0  ;;  %s850_s12 = smov 0   ;;  %s852_s13 = smov 0  }
   0x8   :  { %s854_s14 = smov 0   ;;  %s856_s15 = smov 0  }
   0x9   :  { %s858_s16 = smov 0   ;;  %s860_s17 = smov 0  }
   0xa   :  { %s862_s18 = smov 0   ;;  %s864_s19 = smov 0  }
   0xb   :  { %s866_s20 = smov 0  }
   0xc LB: > { %1123 = sst [smem:[#allocation11_spill]] %s817_s19  ;;  %s503_s21 = sadd.s32 4294967295, %s821_s20   ;;  %s821_s20 = sphi %s866_s20, %s22_s20   ;;  %s817_s19 = sphi %s864_s19, %s1136_s19   ;;  %s813_s18 = sphi %s862_s18, %s1135_s18   ;;  %s809_s17 = sphi %s860_s17, %s1142_s17   ;;  %s805_s16 = sphi %s858_s16, %s1141_s16   ;;  %s801_s15 = sphi %s856_s15, %s1140_s15   ;;  %s797_s14 = sphi %s854_s14, %s1139_s14   ;;  %s793_s13 = sphi %s852_s13, %s1138_s13   ;;  %s789_s12 = sphi %s850_s12, %s1137_s12  }
   0xd   : > { %s504_s22 = sadd.s32 4294967294, %s821_s20   ;;  %s34_s23 = sadd.s32 1, %s817_s19 }
   0xe   : > { %p39_p0 = scmp.lt.s32.totalorder %s817_s19, 1  ;;  %p36_p1 = scmp.ge.s32.totalorder %s34_s23, 2 }
   0xf   : > { %s47_s24 = sadd.s32 1, %s809_s17  ;;  %p54_p2 = scmp.ne.s32.totalorder %s809_s17, %s805_s16 }
  0x10   : > { %s899_s25 = scalar_select %p39_p0, %s817_s19, 1 }
  0x11   : > { %s1144_s23 = smov (%p36_p1, %s34_s23), 0  ;;  %p55_p3 = scmp.eq.s32.totalorder %s821_s20, 0 }
  0x12   : > { %1124 = sst [smem:[#allocation12_spill]] %s1144_s23  ;;  %p42_p4 = scmp.lt.s32.totalorder %s1144_s23, 1 }
  0x13   : > { %p60_p5 = scmp.ne.s32.totalorder %s805_s16, %s801_s15  ;;  %p908_p6 = por %p55_p3, %p54_p2 }
  0x14   : > { %p61_p7 = scmp.eq.s32.totalorder %s503_s21, 0  ;;  %s123_s29 = ssub.s32 %s817_s19, %s1144_s23 }
  0x15   : > { %s43_s27 = scalar_select %p42_p4, %s1144_s23, 1 }
  0x16   : > { %p913_p8 = por %p61_p7, %p60_p5  ;;  %p124_p9 = scmp.eq.s32.totalorder %s123_s29, 0 }
  0x17   : > { %s44_s30 = ssub.s32 %s899_s25, %s43_s27  ;;  %s126_s4 = sadd.s32 1, %s797_s14 }
  0x18   : > { %p45_p10 = scmp.eq.s32.totalorder %s44_s30, 0  ;;  %p136_p11 = scmp.ne.s32.totalorder %s797_s14, %s793_s13 }
  0x19   : > { %s922_s5 = scalar_select %p124_p9, %s797_s14, %s126_s4  }
  0x1a   : > { %s925_s6 = scalar_select %p45_p10, %s809_s17, %s47_s24  }
  0x1b   : > { %p137_p12 = scmp.eq.s32.totalorder %s503_s21, 1  ;;  %p142_p13 = scmp.ne.s32.totalorder %s793_s13, %s789_s12 }
  0x1c   : > { %1127 = sst [smem:[#allocation13_spill]] %s925_s6  ;;  %p143_p0 = scmp.eq.s32.totalorder %s504_s22, 1 }
  0x1d   : > { %p931_p1 = por %p137_p12, %p136_p11  ;;  %p506_p3 = scmp.ge.s32.totalorder %s821_s20, 2 }
  0x1e   : > { %p935_p2 = por %p143_p0, %p142_p13 }
  0x1f   : > { %162 = sbr.rel (%p506_p3) target bundleno = 115 (0x73), region = 20 }
  0x24   : > { %165 = sbr.rel (!%p908_p6) target bundleno = 79 (0x4f), region = 24  ;;  %s166_s9 = sand.u32 (%p908_p6), 1, %s809_s17  }
  0x25   : > { %s508_s10 = sshll.u32 (%p908_p6), %s899_s25, 1  ;;  %s507_s11 = sshll.u32 (%p908_p6), %s166_s9, 4 }
  0x26   : > { %s175_s15 = ssub.s32 (%p908_p6), 3, %s508_s10  ;;  %s949_s27 = scalar_lea.sflag (%p908_p6), [#allocation3], %s166_s9 }
  0x27   : > { %p176_p4 = scmp.lt.s32.totalorder (%p908_p6), %s175_s15, 2  ;;  %s170_s29 = scalar_lea.vmem (%p908_p6), [#allocation2], %s507_s11 }
  0x29   : > { %s1146_s15 = smov (!%p176_p4, %s175_s15), 2 }
  0x2a   : > { %s509_s21 = sshll.u32 %s1146_s15, 3 }
  0x2b   : > { %s179_s22 = ssub.s32 16, %s509_s21 }
  0x2c   : > { %s180_s24 = sshll.u32 %s179_s22, 4 }
  0x2d   : > { %181 = vsyncadd %s949_s27, %s180_s24  ;;  %p952_p5 = scmp.ne.s32.totalorder %s509_s21, 0  ;;  %s533_s4 = sshll.u32 %s899_s25, 4 }
  0x2e   : > { %s1131_s0 = sld [smem:[#allocation14_spill]]  ;;  %s960_s6 = sshll.u32 %s170_s29, 4  ;;  %s189_s6 = int_to_ptr.vmem [resolvable:$true] %s960_s6 }
  0x2f   : > { %s1121_s11 = sshll.u32 %s1146_s15, 7 }
  0x30   : > { %s635_s21 = sshrl.u32 %s1121_s11, 4 }
  0x34   : > { %s184_s19 = scalar_lea.hbm %s1131_s0, %s533_s4  ;;  %s644_s29 = scalar_lea.hbm %s1131_s0, 24 }
  0x35   : > { %s186_s9 = sshll.u32 %s184_s19, 4  ;;  %s963_s9 = int_to_ptr.hbm [resolvable:$true] %s186_s9 }
  0x36   : > { %s633_s22 = sshra.s32 %s963_s9, 4  ;;  %s634_s22 = int_to_ptr.hbm [resolvable:$true] %s633_s22 }
  0x37   : > { %s640_s24 = scalar_lea.hbm %s634_s22, %s635_s21 }
  0x38   : > { %p641_p7 = scmp.ne.s32.totalorder %s634_s22, %s640_s24  ;;  %p646_p11 = scmp.lt.s32.totalorder %s644_s29, %s640_s24 }
  0x3a   : > { %p642_p9 = pnand %p641_p7, %p952_p5 }
  0x3c   : > { %p643_p10 = pneg %p642_p9 }
  0x3e   : > { %p648_p12 = pnand %p646_p11, %p643_p10 }
  0x40   : > { %651 = shalt.err (!%p648_p12)
}
  0x41   : > { %s652_s19 = sshra.s32 %s189_s6, 4  ;;  %s823_s22 = smov [#allocation2]   ;;  %s653_s19 = int_to_ptr.vmem [resolvable:$true] %s652_s19 }
  0x42   : > { %s659_s10 = scalar_lea.vmem %s653_s19, %s635_s21  ;;  %s663_s11 = scalar_lea.vmem %s823_s22, 32 }
  0x43   : > { %p660_p13 = scmp.ne.s32.totalorder %s653_s19, %s659_s10  ;;  %p665_p7 = scmp.lt.s32.totalorder %s663_s11, %s659_s10 }
  0x45   : > { %p661_p0 = pnand %p660_p13, %p952_p5 }
  0x47   : > { %p662_p4 = pneg %p661_p0 }
  0x49   : > { %p667_p9 = pnand %p665_p7, %p662_p4 }
  0x4b   : > { %670 = shalt.err (!%p667_p9)
}
  0x4c   : > { %s824_s23 = smov 128   ;;  %s825_s24 = smov 8  }
  0x4d   : > { %s1132_s4 = sshll.u32 %s1146_s15, 7 }
  0x4e   : > { %194 = dma.hbm_to_vmem [thread:$0]  (%p952_p5), %s963_s9, %s1132_s4, %s189_s6, %s949_s27, %s824_s23, %s824_s23, %s825_s24  }
  0x4f PF: > { %197 = sbr.rel (!%p908_p6) target bundleno = 115 (0x73), region = 28  ;;  %s198_s11 = sand.u32 (%p908_p6), 1, %s809_s17  }
  0x50   : > { %s515_s21 = sshll.u32 (%p908_p6), %s899_s25, 1  ;;  %s514_s29 = sshll.u32 (%p908_p6), %s198_s11, 4 }
  0x51   : > { %s207_s19 = ssub.s32 (%p908_p6), 3, %s515_s21  ;;  %s993_s0 = scalar_lea.sflag (%p908_p6), [#allocation6], %s198_s11 }
  0x52   : > { %p208_p10 = scmp.lt.s32.totalorder (%p908_p6), %s207_s19, 2  ;;  %s202_s6 = scalar_lea.vmem (%p908_p6), [#allocation5], %s514_s29 }
  0x54   : > { %s1148_s19 = smov (!%p208_p10, %s207_s19), 2 }
  0x55   : > { %s516_s10 = sshll.u32 %s1148_s19, 3 }
  0x56   : > { %s211_s22 = ssub.s32 16, %s516_s10 }
  0x57   : > { %s212_s30 = sshll.u32 %s211_s22, 4 }
  0x58   : > { %213 = vsyncadd %s993_s0, %s212_s30  ;;  %p996_p6 = scmp.ne.s32.totalorder %s516_s10, 0  ;;  %s534_s15 = sshll.u32 %s899_s25, 4 }
  0x59   : > { %s216_s23 = scalar_lea.hbm %s1116_s1, %s534_s15  ;;  %s1004_s24 = sshll.u32 %s202_s6, 4  ;;  %s221_s24 = int_to_ptr.vmem [resolvable:$true] %s1004_s24 }
  0x5a   : > { %s218_s4 = sshll.u32 %s216_s23, 4  ;;  %s520_s11 = sshll.u32 %s1148_s19, 7  ;;  %s1007_s4 = int_to_ptr.hbm [resolvable:$true] %s218_s4 }
  0x5b   : > { %s672_s21 = sshra.s32 %s1007_s4, 4  ;;  %s674_s29 = sshrl.u32 %s520_s11, 4  ;;  %s673_s21 = int_to_ptr.hbm [resolvable:$true] %s672_s21 }
  0x5c   : > { %s679_s10 = scalar_lea.hbm %s673_s21, %s674_s29  ;;  %s683_s30 = scalar_lea.hbm %s1116_s1, 24 }
  0x5d   : > { %p680_p5 = scmp.ne.s32.totalorder %s673_s21, %s679_s10  ;;  %p685_p13 = scmp.lt.s32.totalorder %s683_s30, %s679_s10 }
  0x5f   : > { %p681_p11 = pnand %p680_p5, %p996_p6 }
  0x61   : > { %p682_p12 = pneg %p681_p11 }
  0x63   : > { %p687_p0 = pnand %p685_p13, %p682_p12 }
  0x65   : > { %690 = shalt.err (!%p687_p0)
}
  0x66   : > { %s691_s6 = sshra.s32 %s221_s24, 4  ;;  %s826_s27 = smov [#allocation5]   ;;  %s692_s6 = int_to_ptr.vmem [resolvable:$true] %s691_s6 }
  0x67   : > { %s698_s15 = scalar_lea.vmem %s692_s6, %s674_s29  ;;  %s702_s9 = scalar_lea.vmem %s826_s27, 32 }
  0x68   : > { %p699_p4 = scmp.ne.s32.totalorder %s692_s6, %s698_s15  ;;  %p704_p10 = scmp.lt.s32.totalorder %s702_s9, %s698_s15 }
  0x6a   : > { %p700_p7 = pnand %p699_p4, %p996_p6 }
  0x6c   : > { %p701_p9 = pneg %p700_p7 }
  0x6e   : > { %p706_p5 = pnand %p704_p10, %p701_p9 }
  0x70   : > { %709 = shalt.err (!%p706_p5)
}
  0x71   : > { %s827_s23 = smov 128   ;;  %s828_s21 = smov 8  }
  0x72   : > { %226 = dma.hbm_to_vmem [thread:$0]  (%p996_p6), %s1007_s4, %s520_s11, %s221_s24, %s993_s0, %s827_s23, %s827_s23, %s828_s21  }
  0x73 PF: > { %p521_p11 = scmp.ge.s32.totalorder %s821_s20, 1  ;;  %p228_p12 = scmp.lt.s32.totalorder %s821_s20, 3 }
  0x75   : > { %p229_p13 = pnand %p521_p11, %p228_p12 }
  0x76   : > { %s234_s29 = sand.u32 (!%p229_p13), 1, %s805_s16  }
  0x77   : > { %232 = sbr.rel (%p229_p13) target bundleno = 206 (0xce), region = 32  ;;  %s522_s10 = sshll.u32 (!%p229_p13), %s234_s29, 4 }
  0x78   : > { %s235_s25 = scalar_lea.sflag (!%p229_p13), [#allocation3], %s234_s29  ;;  %s238_s22 = scalar_lea.vmem (!%p229_p13), [#allocation2], %s522_s10 }
  0x7c   : > { %776 = dma.done.wait (%p913_p8), %s235_s25, 256  }
  0x7d   : > { %778 = vsyncadd (%p913_p8), %s235_s25, 4294967040  ;;  %s245_s0 = scalar_lea.sflag [#allocation6], %s234_s29  ;;  %s1037_s19 = scalar_lea.vmem [#allocation5], %s522_s10 }
  0x7e   : > { %780 = dma.done.wait (%p913_p8), %s245_s0, 256  }
  0x7f   : > { %782 = vsyncadd (%p913_p8), %s245_s0, 4294967040  ;;  %s274_s26 = sand.u32 1, %s793_s13   ;;  %s525_s24 = sshll.u32 %s813_s18, 4  ;;  %v298_v0 = vld [vmem:[%s238_s22] sm:$0xff]  ;;  %v299_v1 = vld [vmem:[%s238_s22 + $0x8] sm:$0xff]  ;;  %v829_v2 = vmov 0.0  }
  0x80   : > { %s524_s4 = sshll.u32 %s274_s26, 3  ;;  %s537_s11 = sshll.u32 %s813_s18, 11  ;;  %v307_v3 = vand.u32 2147483647, %v298_v0  ;;  %v308_v4 = vand.u32 2147483647, %v299_v1 }
  0x81   : > { %s1048_s30 = sadd.s32 2048, %s537_s11  ;;  %s1050_s6 = scalar_lea.vmem [#allocation7], %s524_s4  ;;  %v624_v15 = vld [vmem:[%s1117_s2] ss:$0 sm:$0xff]  ;;  %v301_v18 = vld [vmem:[%s1037_s19 + $0x8] sm:$0xff]  ;;  %v303_v19 = vsub.f32 0.0, %v298_v0 }
  0x82   : > { %297 = vst [vmem:[%s1050_s6] sm:$0xff] %v829_v2  ;;  %v309_v5 = vsub.f32 0.0, %v307_v3  ;;  %v310_v6 = vsub.f32 0.0, %v308_v4  ;;  %v300_v16 = vld [vmem:[%s1037_s19] sm:$0xff]  ;;  %v304_v22 = vsub.f32 0.0, %v299_v1  ;;  %v343_v26 = vmul.f32 %v624_v15, %v301_v18  ;;  %p527_p8 = scmp.gt.s32.totalorder %s1048_s30, 3072 }
  0x83   : > { %v342_v24 = vmul.f32 %v624_v15, %v300_v16  ;;  %v305_v28 = vmax.f32 %v303_v19, 0.0  ;;  %v335_v30 = vsub.f32 1.0, %v300_v16  ;;  %v336_v34 = vsub.f32 1.0, %v301_v18 }
  0x84   : > { %v311_v7 = vmul.f32 1.442695, %v309_v5  ;;  %v313_v8 = vmul.f32 1.442695, %v310_v6  ;;  %v306_v32 = vmax.f32 %v304_v22, 0.0  ;;  %v345_v38 = vadd.f32 1.0, %v343_v26 }
  0x85   : > { %v344_v36 = vadd.f32 1.0, %v342_v24  ;;  %v337_v41 = vmul.f32 %v335_v30, %v298_v0  ;;  %v338_v43 = vmul.f32 %v336_v34, %v299_v1 }
  0x86   : > { %625 = vpow2.f32 %v311_v7 }
  0x87   : > { %627 = vpow2.f32 %v313_v8 }
  0x8c   : > { %v626_v9 = vpop.eup %625 }
  0x8d   : > { %v628_v10 = vpop.eup %627  ;;  %v315_v11 = vadd.f32 1.0, %v626_v9  ;;  %v318_v12 = vmul.f32 -0.5, %v626_v9  ;;  %v321_v20 = vand.u32 2147483647, %v626_v9 }
  0x8e   : > { %v324_v13 = vadd.f32 1.0, %v628_v10  ;;  %v327_v14 = vmul.f32 -0.5, %v628_v10  ;;  %v330_v23 = vand.u32 2147483647, %v628_v10 }
  0x8f   : > { %629 = vlog2.f32 %v315_v11  ;;  %v319_v17 = vadd.f32 1.0, %v318_v12  ;;  %vm322_vm0 = vcmp.lt.f32.partialorder %v321_v20, 0.0004427343 }
  0x90   : > { %631 = vlog2.f32 %v324_v13  ;;  %v328_v21 = vadd.f32 1.0, %v327_v14  ;;  %vm331_vm1 = vcmp.lt.f32.partialorder %v330_v23, 0.0004427343 }
  0x91   : > { %v320_v25 = vmul.f32 %v626_v9, %v319_v17 }
  0x92   : > { %v329_v29 = vmul.f32 %v628_v10, %v328_v21 }
  0x95   : > { %v630_v27 = vpop.eup %629 }
  0x96   : > { %v632_v31 = vpop.eup %631  ;;  %v317_v33 = vmul.f32 0.6931472, %v630_v27 }
  0x97   : > { %v326_v35 = vmul.f32 0.6931472, %v632_v31 }
  0x98   : > { %v323_v37 = vsel %vm322_vm0, %v320_v25, %v317_v33 }
  0x99   : > { %v332_v39 = vsel %vm331_vm1, %v329_v29, %v326_v35  ;;  %v333_v40 = vadd.f32 %v323_v37, %v305_v28 }
  0x9a   : > { %v334_v42 = vadd.f32 %v332_v39, %v306_v32  ;;  %357 = sbr.rel (%p527_p8) target bundleno = 165 (0xa5), region = 48 }
  0x9b   : > { %v346_v44 = vmul.f32 %v344_v36, %v333_v40 }
  0x9c   : > { %v347_v45 = vmul.f32 %v345_v38, %v334_v42 }
  0x9d   : > { %v348_v46 = vadd.f32 %v346_v44, %v337_v41 }
  0x9e   : > { %v349_v47 = vadd.f32 %v347_v45, %v338_v43 }
  0x9f   : > { %v358_v48 = vld [vmem:[%s1050_s6] sm:$0xff] }
  0xa0   : > { %v359_v49 = vadd.f32 %v349_v47, %v348_v46 }
  0xa2   : > { %v360_v50 = vadd.f32 %v359_v49, %v358_v48 }
  0xa4   : > { %361 = vst [vmem:[%s1050_s6] sm:$0xff] %v360_v50 }
  0xa5 PF: > { %p528_p6 = scmp.le.s32.totalorder %s1048_s30, 3072 }
  0xa7   : > { %365 = sbr.rel (%p528_p6) target bundleno = 191 (0xbf), region = 52 }
  0xac   : > { %v366_v51 = vlaneseq  ;;  %v369_v52 = vstv %s525_s24  ;;  %v378_v63 = vld [vmem:[%s1050_s6] sm:$0xff] }
  0xae   : > { %v367_v53 = vshrl.u32 %v366_v51, 7  ;;  %v373_v56 = vand.u32 127, %v366_v51 }
  0xb0   : > { %v368_v54 = vadd.s32 8, %v367_v53  ;;  %v370_v55 = vadd.s32 %v369_v52, %v367_v53 }
  0xb2   : > { %v371_v57 = vadd.s32 %v369_v52, %v368_v54  ;;  %v374_v58 = vmul.u32 128, %v370_v55 }
  0xb4   : > { %v375_v59 = vmul.u32 128, %v371_v57  ;;  %v376_v60 = vadd.s32 %v374_v58, %v373_v56 }
  0xb6   : > { %v377_v61 = vadd.s32 %v375_v59, %v373_v56  ;;  %vm379_vm2 = vcmp.lt.s32.totalorder %v376_v60, 3072 }
  0xb7   : > { %v381_v62 = vsel %vm379_vm2, %v348_v46, 0.0 }
  0xb8   : > { %vm380_vm3 = vcmp.lt.s32.totalorder %v377_v61, 3072 }
  0xb9   : > { %v382_v0 = vsel %vm380_vm3, %v349_v47, 0.0 }
  0xba   : > { %v383_v1 = vadd.f32 %v382_v0, %v381_v62 }
  0xbc   : > { %v384_v2 = vadd.f32 %v383_v1, %v378_v63 }
  0xbe   : > { %385 = vst [vmem:[%s1050_s6] sm:$0xff] %v384_v2 }
  0xbf PF: > { %s530_s27 = sshll.u32 %s813_s18, 3  ;;  %s399_s29 = sshll.u32 %s1050_s6, 4  ;;  %s400_s29 = int_to_ptr.vmem [resolvable:$true] %s399_s29 }
  0xc0   : > { %s397_s21 = scalar_lea.hbm %s1118_s3, %s530_s27  ;;  %s387_s25 = scalar_lea.sflag [#allocation4], %s274_s26 }
  0xc1   : > { %s401_s10 = sshll.u32 %s397_s21, 4  ;;  %s731_s18 = scalar_lea.hbm %s1118_s3, 16  ;;  %s402_s10 = int_to_ptr.hbm [resolvable:$true] %s401_s10 }
  0xc2   : > { %s725_s22 = sshra.s32 %s402_s10, 4  ;;  %s726_s22 = int_to_ptr.hbm [resolvable:$true] %s725_s22 }
  0xc3   : > { %s727_s0 = scalar_lea.hbm %s726_s22, 8  ;;  %p732_p9 = scmp.lt.s32.totalorder %s726_s22, %s1118_s3 }
  0xc4   : > { %p728_p0 = scmp.ne.s32.totalorder %s726_s22, %s727_s0  ;;  %p733_p10 = scmp.lt.s32.totalorder %s731_s18, %s727_s0 }
  0xc6   : > { %p729_p4 = pnand %p728_p0, %p931_p1  ;;  %p734_p5 = por %p733_p10, %p732_p9 }
  0xc8   : > { %p730_p7 = pneg %p729_p4 }
  0xca   : > { %p735_p11 = pnand %p734_p5, %p730_p7 }
  0xcc   : > { %738 = shalt.err (!%p735_p11)
}
  0xcd   : > { %540 = dma.vmem_to_hbm [thread:$0]  (%p931_p1), %s400_s29, 128, %s402_s10, %s387_s25  }
  0xce PF: > { %s413_s26 = sand.u32 1, %s789_s12   ;;  %p543_p12 = pnand %p506_p3, %p935_p2 }
  0xcf   : > { %s414_s30 = scalar_lea.sflag [#allocation4], %s413_s26 }
  0xd0   : > { %p544_p13 = pneg %p543_p12 }
  0xd2   : > { %784 = dma.done.wait (%p544_p13), %s414_s30, 128  }
  0xd3   : > { %786 = vsyncadd (%p544_p13), %s414_s30, 4294967168  ;;  %s22_s20 = sadd.s32 1, %s821_s20   ;;  %s1134_s7 = sld [smem:[#allocation13_spill]] }
  0xd4   : > { %p19_p8 = scmp.ge.s32.totalorder %s22_s20, 4   ;;  %s1135_s18 = sld [smem:[#allocation11_spill]] }
  0xd5   : > { %s1136_s19 = sld [smem:[#allocation12_spill]]  ;;  %s1137_s12 = smov %s793_s13 }
  0xd6   : > { %s1138_s13 = smov %s797_s14  ;;  %s1139_s14 = smov %s922_s5 }
  0xd7   : > { %s1140_s15 = smov %s805_s16  ;;  %s1141_s16 = smov %s809_s17 }
  0xd8   :  { %21 = sbr.rel (!%p19_p8) target bundleno = 12 (0xc), region = 102 }
  0xd9   : > { %s1142_s17 = smov %s1134_s7 }
  0xdd   :  { %420 = vsyncpa [#allocation3], 1 }
  0xde   :  { %422 = vsyncpa [#allocation3 + $0x1], 1 }
  0xdf   :  { %423 = vsyncpa [#allocation6], 1 }
  0xe0   :  { %425 = vsyncpa [#allocation6 + $0x1], 1 }
  0xe1   :  { %426 = vsyncpa [#allocation4], 1 }
  0xe2   :  { %428 = vsyncpa [#allocation4 + $0x1], 1 }

</bundles_post_ra>
